<compile_context>
chip_gen: v6e
topology: v6e:2x2x1
jax: 0.10.0
libtpu: 0.0.40
codegen_flags: <defaults>
</compile_context>

<pallas_src>
import functools
import math

import jax
import jax.numpy as jnp
from jax.experimental import pallas as pl
from jax.experimental.pallas import tpu as pltpu

_MASK_VALUE = -1e30  # large finite negative (avoids -inf arithmetic)


@functools.lru_cache(maxsize=None)
def _vmem_limit_bytes():
    """<= 3/4 of physical VMEM, capped at 64 MiB (keeps headroom on v7x's
    64 MiB/TC while still allowing large tiles on v5e/v6e)."""
    try:
        cap = pltpu.get_tpu_info().vmem_capacity_bytes
        return int(min(64 * 1024 * 1024, (cap * 3) // 4))
    except Exception:
        return 48 * 1024 * 1024


def _choose_tile(dim, pref, align):
    """Largest tile <= pref that is a multiple of `align` and evenly divides
    `dim`; falls back to the full dimension (always a legal block size)."""
    if dim <= pref:
        return dim
    t = (pref // align) * align
    while t >= align:
        if dim % t == 0:
            return t
        t -= align
    return dim


def _lcm(a, b):
    return a * b // math.gcd(a, b)


# ----------------------------- tiled matmul ------------------------------- #
def _matmul_kernel(x_ref, w_ref, o_ref, acc_ref):
    @pl.when(pl.program_id(2) == 0)
    def _init():
        acc_ref[...] = jnp.zeros(acc_ref.shape, acc_ref.dtype)

    acc_ref[...] += jnp.dot(
        x_ref[...], w_ref[...], preferred_element_type=jnp.float32
    )

    @pl.when(pl.program_id(2) == pl.num_programs(2) - 1)
    def _finalize():
        o_ref[...] = acc_ref[...].astype(o_ref.dtype)


def pallas_matmul(x, w, *, tm_pref=512, tn_pref=1024, tk_pref=512):
    """x: (M, K), w: (K, N) -> (M, N). Tiled, pipelined, f32 accumulation.
    (Weights must already be stored (in, out); see prepare_params.)"""
    M, K = x.shape
    K2, N = w.shape
    assert K == K2
    tm = _choose_tile(M, tm_pref, 8)
    tn = _choose_tile(N, tn_pref, 128)
    tk = _choose_tile(K, tk_pref, 128)
    grid = (M // tm, N // tn, K // tk)
    return pl.pallas_call(
        _matmul_kernel,
        out_shape=jax.ShapeDtypeStruct((M, N), x.dtype),
        grid=grid,
        in_specs=[
            pl.BlockSpec((tm, tk), lambda i, j, k: (i, k)),
            pl.BlockSpec((tk, tn), lambda i, j, k: (k, j)),
        ],
        out_specs=pl.BlockSpec((tm, tn), lambda i, j, k: (i, j)),
        scratch_shapes=[pltpu.VMEM((tm, tn), jnp.float32)],
        compiler_params=pltpu.CompilerParams(
            dimension_semantics=("parallel", "parallel", "arbitrary"),
            vmem_limit_bytes=_vmem_limit_bytes(),
        ),
    )(x, w)


# ------------------- tiled matmul with fused RoPE epilogue ------------------ #
def _matmul_rope_kernel(x_ref, w_ref, cos_ref, sin_ref, o_ref, acc_ref, *, head_dim):
    @pl.when(pl.program_id(2) == 0)
    def _init():
        acc_ref[...] = jnp.zeros(acc_ref.shape, acc_ref.dtype)

    acc_ref[...] += jnp.dot(
        x_ref[...], w_ref[...], preferred_element_type=jnp.float32
    )

    @pl.when(pl.program_id(2) == pl.num_programs(2) - 1)
    def _finalize():
        D = head_dim
        half = D // 2
        cos = cos_ref[...].astype(jnp.float32)        # (tm, D)
        sin = sin_ref[...].astype(jnp.float32)        # (tm, D), rotate_half sign folded
        n_groups = acc_ref.shape[1] // D
        for g in range(n_groups):                     # static unroll over head columns
            a = acc_ref[:, g * D:(g + 1) * D]
            if D % 128 == 0:
                rot = pltpu.roll(a, shift=half, axis=-1)   # cheap XLU lane rotation
            else:
                rot = jnp.roll(a, half, axis=-1)
            o_ref[:, g * D:(g + 1) * D] = (a * cos + rot * sin).astype(o_ref.dtype)


def pallas_matmul_rope(x, w, cos, sin_signed, *, seq_len, head_dim,
                       tm_pref=512, tn_pref=1024, tk_pref=512):
    """x: (M, K) with M = B*seq_len, w: (K, N) with N = H*head_dim.
    y = x @ w, then RoPE applied per head column group in the finalize epilogue:
        y_h * cos + roll(y_h, D/2) * sin_signed
    (rotate_half sign folded into the sin table; the caller may additionally
    fold the 1/sqrt(D) attention scale into cos/sin for the q side)."""
    M, K = x.shape
    K2, N = w.shape
    D = head_dim
    assert K == K2 and M % seq_len == 0 and N % D == 0
    tm = _choose_tile(seq_len, tm_pref, 8)        # row tiles never straddle a batch
    tn = _choose_tile(N, tn_pref, _lcm(128, D))   # head-aligned, lane-dense columns
    tk = _choose_tile(K, tk_pref, 128)
    n_seq_blocks = seq_len // tm
    grid = (M // tm, N // tn, K // tk)
    kernel = functools.partial(_matmul_rope_kernel, head_dim=D)
    return pl.pallas_call(
        kernel,
        out_shape=jax.ShapeDtypeStruct((M, N), x.dtype),
        grid=grid,
        in_specs=[
            pl.BlockSpec((tm, tk), lambda i, j, k: (i, k)),
            pl.BlockSpec((tk, tn), lambda i, j, k: (k, j)),
            pl.BlockSpec((tm, D), lambda i, j, k: (i % n_seq_blocks, 0)),
            pl.BlockSpec((tm, D), lambda i, j, k: (i % n_seq_blocks, 0)),
        ],
        out_specs=pl.BlockSpec((tm, tn), lambda i, j, k: (i, j)),
        scratch_shapes=[pltpu.VMEM((tm, tn), jnp.float32)],
        compiler_params=pltpu.CompilerParams(
            dimension_semantics=("parallel", "parallel", "arbitrary"),
            vmem_limit_bytes=_vmem_limit_bytes(),
        ),
    )(x, w, cos, sin_signed)


# ------------------------- flash attention kernel -------------------------- #
def _flash_attn_kernel(q_ref, k_ref, v_ref, o_ref, m_ref, l_ref, acc_ref,
                       *, num_heads, head_dim):
    H, D = num_heads, head_dim
    tq = q_ref.shape[1]
    tk = k_ref.shape[1]
    qi = pl.program_id(1)
    kv = pl.program_id(2)
    n_kv = pl.num_programs(2)

    @pl.when(kv == 0)
    def _init():
        m_ref[...] = jnp.full(m_ref.shape, _MASK_VALUE, m_ref.dtype)
        l_ref[...] = jnp.zeros(l_ref.shape, l_ref.dtype)
        acc_ref[...] = jnp.zeros(acc_ref.shape, acc_ref.dtype)

    def online_softmax_update(apply_mask):
        if apply_mask:
            # In-kernel causal mask only for diagonal-straddling tiles.
            q_pos = qi * tq + jax.lax.broadcasted_iota(jnp.int32, (tq, tk), 0)
            k_pos = kv * tk + jax.lax.broadcasted_iota(jnp.int32, (tq, tk), 1)
            causal = q_pos >= k_pos
        # TODO(synk): for H=32-class configs switch this static unroll to a
        # lax.fori_loop (unroll=2..4) with pl.ds(h*D, D) ref slices to bound
        # instruction footprint and compile time.
        for h in range(H):                                   # static unroll over heads
            q_h = q_ref[0, :, h * D:(h + 1) * D]             # per-head slab loads only
            k_h = k_ref[0, :, h * D:(h + 1) * D]
            v_h = v_ref[0, :, h * D:(h + 1) * D]
            # q already carries RoPE and the 1/sqrt(D) scale; k carries RoPE.
            s = jax.lax.dot_general(                         # q @ k^T
                q_h, k_h, (((1,), (1,)), ((), ())),
                preferred_element_type=jnp.float32)
            if apply_mask:
                s = jnp.where(causal, s, _MASK_VALUE)
            m_prev = m_ref[h]                                # (tq, 1)
            m_new = jnp.maximum(m_prev, jnp.max(s, axis=-1, keepdims=True))
            alpha = jnp.exp(m_prev - m_new)
            p = jnp.exp(s - m_new)
            l_ref[h] = alpha * l_ref[h] + jnp.sum(p, axis=-1, keepdims=True)
            acc_ref[h] = alpha * acc_ref[h] + jnp.dot(
                p.astype(v_h.dtype), v_h, preferred_element_type=jnp.float32)
            m_ref[h] = m_new

    # Fast path: kv tile entirely at/below the causal diagonal -> mask-free.
    @pl.when(kv * tk + tk - 1 <= qi * tq)
    def _full_tile():
        online_softmax_update(apply_mask=False)

    # Diagonal-straddling tiles need the mask; tiles entirely above the diagonal
    # are skipped (their K/V DMA is elided by the kv index-map clamp).
    @pl.when(jnp.logical_and(kv * tk + tk - 1 > qi * tq,
                             kv * tk <= qi * tq + tq - 1))
    def _diag_tile():
        online_softmax_update(apply_mask=True)

    @pl.when(kv == n_kv - 1)
    def _finalize():
        for h in range(H):
            inv_l = pl.reciprocal(l_ref[h], approx=False)   # exact, reference parity
            # Per-head slab store (no (tq, hidden) concatenate -> no spills).
            o_ref[0, :, h * D:(h + 1) * D] = (acc_ref[h] * inv_l).astype(o_ref.dtype)


def pallas_flash_attention(q, k, v, num_heads, *, tq_pref=256, tk_pref=256):
    """q/k/v: (B, S, hidden) channels-last; heads are contiguous D-wide column
    groups of the hidden axis (no (B,H,S,D) transposes).  q must already carry
    RoPE and the 1/sqrt(D) scale; k must carry RoPE.
    (On v5e prefer tq_pref=tk_pref=128; 256 fills the v6e/v7x 256-wide MXU.)"""
    B, S, hidden = q.shape
    D = hidden // num_heads
    tq = _choose_tile(S, tq_pref, 8)
    tk = _choose_tile(S, tk_pref, 8)
    grid = (B, S // tq, S // tk)

    def kv_index_map(b, i, j):
        # Clamp to the last kv block the causal mask can reach for this q tile:
        # fully-masked tiles then repeat the previous block index and Pallas
        # elides their HBM->VMEM DMA entirely (~2x K/V bandwidth saved).
        last_needed = (i * tq + tq - 1) // tk
        return (b, jnp.minimum(j, last_needed), 0)

    q_spec = pl.BlockSpec((1, tq, hidden), lambda b, i, j: (b, i, 0))
    kv_spec = pl.BlockSpec((1, tk, hidden), kv_index_map)
    out_spec = pl.BlockSpec((1, tq, hidden), lambda b, i, j: (b, i, 0))

    kernel = functools.partial(_flash_attn_kernel, num_heads=num_heads, head_dim=D)

    return pl.pallas_call(
        kernel,
        out_shape=jax.ShapeDtypeStruct((B, S, hidden), q.dtype),
        grid=grid,
        in_specs=[q_spec, kv_spec, kv_spec],
        out_specs=out_spec,
        scratch_shapes=[
            # TODO(synk): (H, tq, 1) f32 pads the lane dim 1->128 (~4 MiB each at
            # H=32, tq=256); padding is accounted for in the VMEM budget here —
            # switch to a lane-dense layout when targeting v7x at full size.
            pltpu.VMEM((num_heads, tq, 1), jnp.float32),    # m (running max)
            pltpu.VMEM((num_heads, tq, 1), jnp.float32),    # l (running denom)
            pltpu.VMEM((num_heads, tq, D), jnp.float32),    # acc (unnormalized PV)
        ],
        compiler_params=pltpu.CompilerParams(
            dimension_semantics=("parallel", "parallel", "arbitrary"),
            vmem_limit_bytes=_vmem_limit_bytes(),
        ),
    )(q, k, v)


# ------------------------------ full forward ------------------------------- #
def rope_tables(seq_len, head_dim, rope_theta, dtype):
    pos = jnp.arange(seq_len, dtype=jnp.float32)
    inv_freq = 1.0 / (
        rope_theta ** (jnp.arange(0, head_dim, 2, dtype=jnp.float32) / head_dim)
    )
    freqs = pos[:, None] * inv_freq[None, :]            # (S, D/2)
    emb = jnp.concatenate([freqs, freqs], axis=-1)      # (S, D)
    return jnp.cos(emb).astype(dtype), jnp.sin(emb).astype(dtype)


def prepare_params(raw):
    """One-time parameter relayout (analogous to load time): nn.Linear weights
    (out, in) -> (in, out) so the kernels never see a .T."""
    return {
        "q_v": raw["q_v_proj"].T,   # (hidden, r)
        "k_v": raw["k_v_proj"].T,   # (hidden, r)
        "v": raw["v_proj"].T,       # (hidden, hidden)
        "q_u": raw["q_u_proj"].T,   # (r, hidden)
        "k_u": raw["k_u_proj"].T,   # (r, hidden)
        "o": raw["o_proj"].T,       # (hidden, hidden)
    }


def svd_llama_attention_forward(hidden_states, prep, num_heads, rope_theta=10000.0):
    B, S, hidden = hidden_states.shape
    D = hidden // num_heads
    x2d = hidden_states.reshape(B * S, hidden)

    # First stage: independent down/value projections, each written straight to
    # its own buffer (no fused-output slicing -> no extra HBM round trip).
    q_low = pallas_matmul(x2d, prep["q_v"])              # (M, r)
    k_low = pallas_matmul(x2d, prep["k_v"])              # (M, r)
    v = pallas_matmul(x2d, prep["v"])                    # (M, hidden)

    cos, sin = rope_tables(S, D, rope_theta, hidden_states.dtype)
    half = D // 2
    sin_signed = jnp.concatenate([-sin[:, :half], sin[:, half:]], axis=-1)
    scale = 1.0 / math.sqrt(D)

    # Second stage: up-projections with RoPE fused into the matmul epilogue.
    # The 1/sqrt(D) attention scale is folded into the q-side tables.
    q = pallas_matmul_rope(q_low, prep["q_u"], cos * scale, sin_signed * scale,
                           seq_len=S, head_dim=D)        # (M, hidden)
    k = pallas_matmul_rope(k_low, prep["k_u"], cos, sin_signed,
                           seq_len=S, head_dim=D)        # (M, hidden)

    attn = pallas_flash_attention(
        q.reshape(B, S, hidden), k.reshape(B, S, hidden), v.reshape(B, S, hidden),
        num_heads)                                       # (B, S, hidden)

    out = pallas_matmul(attn.reshape(B * S, hidden), prep["o"])
    return out.reshape(B, S, hidden)


# ------------------------------- reference --------------------------------- #
def reference_forward(hidden_states, params, num_heads, rope_theta=10000.0):
    B, S, hidden = hidden_states.shape
    head_dim = hidden // num_heads
    x = hidden_states

    q = (x @ params["q_v_proj"].T) @ params["q_u_proj"].T
    k = (x @ params["k_v_proj"].T) @ params["k_u_proj"].T
    v = x @ params["v_proj"].T

    def heads(t):
        return t.reshape(B, S, num_heads, head_dim).transpose(0, 2, 1, 3)

    q, k, v = heads(q), heads(k), heads(v)

    cos, sin = rope_tables(S, head_dim, rope_theta, x.dtype)
    cos = cos[None, None]
    sin = sin[None, None]

    def rotate_half(t):
        return jnp.concatenate([-t[..., head_dim // 2:], t[..., : head_dim // 2]], -1)

    q = q * cos + rotate_half(q) * sin
    k = k * cos + rotate_half(k) * sin

    scores = jnp.einsum("bhqd,bhkd->bhqk", q, k) / math.sqrt(head_dim)
    neg = jnp.finfo(jnp.float32).min
    mask = jnp.where(jnp.arange(S)[None, :] <= jnp.arange(S)[:, None], 0.0, neg)
    scores = scores + mask
    p = jax.nn.softmax(scores.astype(jnp.float32), axis=-1).astype(q.dtype)
    o = jnp.einsum("bhqk,bhkd->bhqd", p, v)
    o = o.transpose(0, 2, 1, 3).reshape(B, S, hidden)
    return o @ params["o_proj"].T


# ---------------------------------- main ----------------------------------- #
if __name__ == "__main__":
    # Small LlamaConfig-like setup
    batch, seq, hidden = 2, 8, 32
    num_heads = 4                        # head_dim = 8; num_key_value_heads == num_heads
    ratio = 1.0
    low_rank = int(hidden * ratio / 2)   # 16

    key = jax.random.PRNGKey(0)
    ks = jax.random.split(key, 7)
    scale = 0.05
    params = {
        "q_v_proj": scale * jax.random.normal(ks[0], (low_rank, hidden), jnp.float32),
        "q_u_proj": scale * jax.random.normal(ks[1], (hidden, low_rank), jnp.float32),
        "k_v_proj": scale * jax.random.normal(ks[2], (low_rank, hidden), jnp.float32),
        "k_u_proj": scale * jax.random.normal(ks[3], (hidden, low_rank), jnp.float32),
        "v_proj": scale * jax.random.normal(ks[4], (hidden, hidden), jnp.float32),
        "o_proj": scale * jax.random.normal(ks[5], (hidden, hidden), jnp.float32),
    }
    hidden_states = jax.random.normal(ks[6], (batch, seq, hidden), jnp.float32)

    prep = prepare_params(params)        # one-time weight relayout
    out = svd_llama_attention_forward(hidden_states, prep, num_heads)
    out = jax.block_until_ready(out)

    ref = reference_forward(hidden_states, params, num_heads)
    assert out.shape == (batch, seq, hidden)
    assert jnp.allclose(out, ref, atol=1e-4, rtol=1e-3), "mismatch vs reference"

    print("KERNEL_OK")
</pallas_src>

<mosaic_0001>
module attributes {stable_mosaic.version = 11 : i64} {
  func.func @_matmul_kernel(%arg0: i32, %arg1: i32, %arg2: i32, %arg3: memref<16x32xf32, #tpu.memory_space<vmem>>, %arg4: memref<32x16xf32, #tpu.memory_space<vmem>>, %arg5: memref<16x16xf32, #tpu.memory_space<vmem>>, %arg6: memref<16x16xf32, #tpu.memory_space<vmem>>) attributes {dimension_semantics = [#tpu.dimension_semantics<parallel>, #tpu.dimension_semantics<parallel>, #tpu.dimension_semantics<arbitrary>], iteration_bounds = array<i64: 1, 1, 1>, scalar_prefetch = 0 : i64, scratch_operands = 1 : i64, tpu.core_type = #tpu.core_type<tc>, window_params = [{transform_indices = @transform_0, window_bounds = array<i64: 16, 32>}, {transform_indices = @transform_1, window_bounds = array<i64: 32, 16>}, {transform_indices = @transform_2, window_bounds = array<i64: 16, 16>}]} {
    %c0_i32 = arith.constant 0 : i32
    %0 = arith.cmpi eq, %arg2, %c0_i32 : i32
    %1 = arith.extui %0 : i1 to i32
    %c0_i32_0 = arith.constant 0 : i32
    %2 = arith.cmpi ne, %1, %c0_i32_0 : i32
    scf.if %2 {
      %cst_10 = arith.constant 0.000000e+00 : f32
      %12 = vector.broadcast %cst_10 : f32 to vector<16x16xf32>
      %c0_11 = arith.constant 0 : index
      %c0_12 = arith.constant 0 : index
      %13 = vector.load %arg6[%c0_11, %c0_12] : memref<16x16xf32, #tpu.memory_space<vmem>>, vector<16x16xf32>
      tpu.vector_store %arg6[%c0_11, %c0_12], %12 {strides = array<i32>} : memref<16x16xf32, #tpu.memory_space<vmem>>, vector<16x16xf32>,
    } else {
    }
    %c0 = arith.constant 0 : index
    %c0_1 = arith.constant 0 : index
    %3 = vector.load %arg6[%c0, %c0_1] : memref<16x16xf32, #tpu.memory_space<vmem>>, vector<16x16xf32>
    %c0_2 = arith.constant 0 : index
    %c0_3 = arith.constant 0 : index
    %4 = vector.load %arg3[%c0_2, %c0_3] : memref<16x32xf32, #tpu.memory_space<vmem>>, vector<16x32xf32>
    %c0_4 = arith.constant 0 : index
    %c0_5 = arith.constant 0 : index
    %5 = vector.load %arg4[%c0_4, %c0_5] : memref<32x16xf32, #tpu.memory_space<vmem>>, vector<32x16xf32>
    %cst = arith.constant dense<0.000000e+00> : vector<16x16xf32>
    %6 = tpu.matmul %4, %5, %cst {dimension_numbers = #tpu.dot_dimension_numbers<[1], [0], [0], [1], [0, 0, 1, 1], [], []>} : vector<16x32xf32>, vector<32x16xf32>, vector<16x16xf32> -> vector<16x16xf32>
    %7 = arith.addf %3, %6 : vector<16x16xf32>
    %c0_6 = arith.constant 0 : index
    %c0_7 = arith.constant 0 : index
    %8 = vector.load %arg6[%c0_6, %c0_7] : memref<16x16xf32, #tpu.memory_space<vmem>>, vector<16x16xf32>
    tpu.vector_store %arg6[%c0_6, %c0_7], %7 {strides = array<i32>} : memref<16x16xf32, #tpu.memory_space<vmem>>, vector<16x16xf32>,
    %c0_i32_8 = arith.constant 0 : i32
    %9 = arith.cmpi eq, %arg2, %c0_i32_8 : i32
    %10 = arith.extui %9 : i1 to i32
    %c0_i32_9 = arith.constant 0 : i32
    %11 = arith.cmpi ne, %10, %c0_i32_9 : i32
    scf.if %11 {
      %c0_10 = arith.constant 0 : index
      %c0_11 = arith.constant 0 : index
      %12 = vector.load %arg6[%c0_10, %c0_11] : memref<16x16xf32, #tpu.memory_space<vmem>>, vector<16x16xf32>
      %c0_12 = arith.constant 0 : index
      %c0_13 = arith.constant 0 : index
      %13 = vector.load %arg5[%c0_12, %c0_13] : memref<16x16xf32, #tpu.memory_space<vmem>>, vector<16x16xf32>
      tpu.vector_store %arg5[%c0_12, %c0_13], %12 {strides = array<i32>} : memref<16x16xf32, #tpu.memory_space<vmem>>, vector<16x16xf32>,
    } else {
    }
    return
  }
  func.func @transform_0(%arg0: i32, %arg1: i32, %arg2: i32) -> (i32, i32) {
    %c0_i32 = arith.constant 0 : i32
    return %arg0, %arg2 : i32, i32
  }
  func.func @transform_1(%arg0: i32, %arg1: i32, %arg2: i32) -> (i32, i32) {
    %c0_i32 = arith.constant 0 : i32
    return %arg2, %arg1 : i32, i32
  }
  func.func @transform_2(%arg0: i32, %arg1: i32, %arg2: i32) -> (i32, i32) {
    %c0_i32 = arith.constant 0 : i32
    return %arg0, %arg1 : i32, i32
  }
}

</mosaic_0001>

<bundles_post_ra>
// kernel: tpu_custom_call.1
= control target key start
LH: loop header
LB: loop body
LE: loop exit
PB: predicated region body
PF: predicated region fallthrough
CT: control target
= control target key end

     0   :  { %vm27_vm0 = vcmask 261120   ;;  %vm16_vm1 = vcmask 130048   ;;  %v182_v3 = vmov 0.0   ;;  %s230_s0 = inlined_call_operand.vmem [shape: f32[16,32], index: 0, kind: input, shape index: {}]   ;;  %s231_s1 = inlined_call_operand.vmem [shape: f32[32,16], index: 1, kind: input, shape index: {}]   ;;  %s232_s2 = inlined_call_operand.hbm [shape: f32[16,16], index: 2, kind: output, shape index: {}]  }
   0x1   :  { %v26_v0 = vld [vmem:[%s231_s1 + $0x18] sm:$0xff]  ;;  %v25_v1 = vld [vmem:[%s231_s1 + $0x10] sm:$0xff]  ;;  %v21_v2 = vld [vmem:[%s230_s0] sm:$0xff]  ;;  %18 = vst.msk [vmem:[#allocation2 + $0x8] sm:$0xff] %vm16_vm1, %v182_v3 }
   0x2   :  { %145 = vmatprep.subr.mxu0 %v26_v0  ;;  %17 = vst.msk [vmem:[#allocation2] sm:$0xff] %vm16_vm1, %v182_v3  ;;  %v24_v4 = vld [vmem:[%s231_s1 + $0x8] sm:$0xff]  ;;  %153 = vmatprep.mubr.msk.f32.mxu0 %vm27_vm0, %v21_v2 }
   0x3   :  { %146 = vmatpush3.msra.mxu0 %v26_v0 }
   0x4   :  { %7 = vsyncpa [#allocation4], 0  ;;  %147 = vmatprep.subr.mxu0 %v25_v1  ;;  %v23_v5 = vld [vmem:[%s231_s1] sm:$0xff]  ;;  %v22_v6 = vld [vmem:[%s230_s0 + $0x8] sm:$0xff]  ;;  %s183_s1 = smov [#allocation3]  }
   0x5   :  { %148 = vmatpush3.msra.mxu0 %v25_v1  ;;  %s126_s21 = sshll.u32 %s183_s1, 4  ;;  %s127_s21 = int_to_ptr.vmem [resolvable:$true] %s126_s21 }
   0x6   :  { %149 = vmatprep.subr.mxu0 %v24_v4  ;;  %s160_s0 = scalar_lea.vmem %s127_s21, 256  ;;  %p165_p1 = scmp.lt.s32.totalorder %s127_s21, %s127_s21 }
   0x7   :  { %150 = vmatpush3.msra.mxu0 %v24_v4  ;;  %p161_p0 = scmp.ne.s32.totalorder %s127_s21, %s160_s0  ;;  %p166_p2 = scmp.lt.s32.totalorder %s160_s0, %s160_s0 }
   0x8   :  { %151 = vmatprep.subr.mxu0 %v23_v5  ;;  %v20_v7 = vld [vmem:[#allocation2 + $0x8] sm:$0xff] }
   0x9   :  { %152 = vmatpush3.msra.mxu0 %v23_v5  ;;  %v19_v9 = vld [vmem:[#allocation2] sm:$0xff]  ;;  %p167_p3 = por %p166_p2, %p165_p1 }
   0xa   :  { %154 = vmatmul.mubr.msk.f32.vlgmr.msra.gmra.mxu0 %vm27_vm0, %v22_v6 }
   0xb   :  { %p168_p4 = pnand %p167_p3, %p161_p0 }
  0xca   :  { %v155_v8 = vpop.f32.mrf.mxu0 }
  0xcb   :  { %v110_v10 = vadd.f32 %v155_v8, %v20_v7 }
  0xcc   :  { %v100_v11 = vpop.f32.mrf.mxu0 }
  0xcd   :  { %113 = vst.msk [vmem:[#allocation2 + $0x8] sm:$0xff] %vm16_vm1, %v110_v10  ;;  %v109_v12 = vadd.f32 %v100_v11, %v19_v9 }
  0xcf   :  { %112 = vst.msk [vmem:[#allocation2] sm:$0xff] %vm16_vm1, %v109_v12 }
  0xd4   :  { %v118_v13 = vld [vmem:[#allocation2 + $0x8] sm:$0xff] }
  0xd5   :  { %120 = vst.msk [vmem:[#allocation3 + $0x8] sm:$0xff] %vm16_vm1, %v118_v13 }
  0xd6   :  { %v117_v14 = vld [vmem:[#allocation2] sm:$0xff] }
  0xd7   :  { %119 = vst.msk [vmem:[#allocation3] sm:$0xff] %vm16_vm1, %v117_v14 }
  0xd8   :  { %171 = shalt.err (!%p168_p4)
}
  0xd9   :  { %s184_s22 = smov 128   ;;  %s185_s23 = smov 8  }
  0xda   :  { %132 = dma.vmem_to_hbm [thread:$0]  %s127_s21, 256, %s232_s2, [#allocation4], %s184_s22, %s184_s22, %s185_s23  }
  0xdb   :  { %180 = dma.done.wait [#allocation4], 256  }
  0xdc   :  { %181 = vsyncadd [#allocation4], 4294967040 }
  0xdd   :  { %136 = vsyncpa [#allocation4], 1 }

</bundles_post_ra>
